<compile_context>
chip_gen: v6e
topology: v6e:2x2x1
jax: 0.10.0
libtpu: 0.0.40
codegen_flags: <defaults>
</compile_context>

<pallas_src>
import jax
import jax.numpy as jnp
from jax.experimental import pallas as pl
from jax.experimental.pallas import tpu as pltpu


def _fused_head_kernel(x_ref, w_ref, b_ref, out_ref):
    # x_ref:   (B, V*C, HW)  bf16  -- all 6 views, batch-major / view-major / channel-minor
    # w_ref:   (V*C, 128)    bf16  -- folded frozen backbone+classifier column tile (1/HW absorbed)
    # b_ref:   (1, 128)      f32   -- folded bias column tile
    # out_ref: (B, 128)      f32   -- lane-dense output tile
    x = x_ref[...].astype(jnp.float32)
    gap = jnp.sum(x, axis=-1)                                  # (B, V*C); XLU lane-reduce, f32
    out = jnp.dot(gap.astype(jnp.bfloat16), w_ref[...],
                  preferred_element_type=jnp.float32)          # MXU, f32 accumulate
    out_ref[...] = out + b_ref[...]                            # bias add on VPU


def multiview_frozen_forward(x, w_b, b_b, w_cls_flat, b_cls):
    """Forward of `newmodel_freeze` with a synthetic frozen backbone (GAP -> Linear).

    x:          (V, B, C, H, W) float32 -- 6 views, NCHW each.
    w_b, b_b:   frozen backbone head: (C, F), (1, F).
    w_cls_flat: (V*F, NC) classifier weight; b_cls: (1, NC).
    returns:    (B, NC) float32.
    """
    V, B, C, H, W = x.shape
    HW = H * W
    F = w_b.shape[1]
    NC = w_cls_flat.shape[1]
    NCp = ((NC + 127) // 128) * 128            # lane-dense padded classifier width

    # ---- one-time frozen-weight folding (valid because the backbone is frozen) ----
    w_cls = w_cls_flat.reshape(V, F, NC)                             # per-view row blocks
    w_comb = jnp.einsum('cf,vfn->vcn', w_b, w_cls) / HW              # (V, C, NC), 1/HW of GAP folded in
    w_comb_flat = w_comb.reshape(V * C, NC)                          # view-major, channel-minor
    b_comb = b_b @ jnp.sum(w_cls, axis=0) + b_cls                    # (1, NC)

    # zero-pad NC -> NCp so padded lanes contribute nothing
    w_pad = jnp.zeros((V * C, NCp), jnp.float32).at[:, :NC].set(w_comb_flat)
    b_pad = jnp.zeros((1, NCp), jnp.float32).at[:, :NC].set(b_comb)

    # ---- layout plumbing (wrapper-side): views-major -> batch-major so GAP yields (B, V*C) ----
    x_bvc = jnp.transpose(x.reshape(V, B, C, HW), (1, 0, 2, 3)).reshape(B, V * C, HW)

    # bf16 streaming inputs; f32 accumulation inside the kernel
    x_bf = x_bvc.astype(jnp.bfloat16)
    w_bf = w_pad.astype(jnp.bfloat16)

    out_p = pl.pallas_call(
        _fused_head_kernel,
        out_shape=jax.ShapeDtypeStruct((B, NCp), jnp.float32),
        grid=(NCp // 128,),                                        # single step for NC <= 128
        in_specs=[
            pl.BlockSpec((B, V * C, HW), lambda j: (0, 0, 0)),     # whole input, resident
            pl.BlockSpec((V * C, 128), lambda j: (0, j)),          # folded-weight column tile
            pl.BlockSpec((1, 128), lambda j: (0, j)),              # bias column tile
        ],
        out_specs=pl.BlockSpec((B, 128), lambda j: (0, j)),        # lane-dense output tile
        compiler_params=pltpu.CompilerParams(
            dimension_semantics=("parallel",),                     # independent output columns
        ),
    )(x_bf, w_bf, b_pad)

    return out_p[:, :NC]


if __name__ == "__main__":
    # Small shapes consistent with the module's forward: 6 views, NCHW per view.
    V, B, C, H, W = 6, 2, 4, 16, 16
    F = 32            # per-view backbone feature dim (stand-in for 768/1024/...)
    NC = 10           # num_classes
    # drop_rate = 0 in this configuration -> Dropout branches are skipped.

    key = jax.random.PRNGKey(0)
    kx, kwb, kbb, kwc, kbc = jax.random.split(key, 5)

    x = jax.random.normal(kx, (V, B, C, H, W), dtype=jnp.float32)
    w_b = jax.random.normal(kwb, (C, F), dtype=jnp.float32) * 0.1
    b_b = jax.random.normal(kbb, (1, F), dtype=jnp.float32) * 0.1
    w_cls_flat = jax.random.normal(kwc, (V * F, NC), dtype=jnp.float32) * 0.1
    b_cls = jax.random.normal(kbc, (1, NC), dtype=jnp.float32) * 0.1

    out = multiview_frozen_forward(x, w_b, b_b, w_cls_flat, b_cls)
    out = jax.block_until_ready(out)

    # Pure-JAX f32 reference of the ORIGINAL (unfolded) forward:
    # per-view backbone (GAP -> Linear) -> flatten -> concat over views -> classifier.
    x_flat = x.reshape(V, B, C, H * W)
    feats = jnp.mean(x_flat, axis=-1) @ w_b + b_b                   # (V, B, F)
    concat = jnp.transpose(feats, (1, 0, 2)).reshape(B, V * F)      # (B, V*F)
    ref = concat @ w_cls_flat + b_cls                               # (B, NC)

    assert out.shape == (B, NC)
    assert jnp.allclose(out, ref, atol=1e-2, rtol=1e-2), "mismatch vs reference"
    print("KERNEL_OK")
</pallas_src>

<mosaic_0001>
module attributes {stable_mosaic.version = 11 : i64} {
  func.func @_fused_head_kernel(%arg0: i32, %arg1: memref<2x24x256xbf16, #tpu.memory_space<vmem>>, %arg2: memref<24x128xbf16, #tpu.memory_space<vmem>>, %arg3: memref<1x128xf32, #tpu.memory_space<vmem>>, %arg4: memref<2x128xf32, #tpu.memory_space<vmem>>) attributes {dimension_semantics = [#tpu.dimension_semantics<parallel>], iteration_bounds = array<i64: 1>, scalar_prefetch = 0 : i64, scratch_operands = 0 : i64, tpu.core_type = #tpu.core_type<tc>, window_params = [{pipeline_mode = #tpu.pipeline_mode<synchronous>, transform_indices = @transform_0, window_bounds = array<i64: 2, 24, 256>}, {transform_indices = @transform_1, window_bounds = array<i64: 24, 128>}, {transform_indices = @transform_2, window_bounds = array<i64: 1, 128>}, {transform_indices = @transform_3, window_bounds = array<i64: 2, 128>}]} {
    %c0 = arith.constant 0 : index
    %c0_0 = arith.constant 0 : index
    %c0_1 = arith.constant 0 : index
    %0 = vector.load %arg1[%c0, %c0_0, %c0_1] : memref<2x24x256xbf16, #tpu.memory_space<vmem>>, vector<2x24x256xbf16>
    %1 = arith.extf %0 : vector<2x24x256xbf16> to vector<2x24x256xf32>
    %cst = arith.constant dense<0.000000e+00> : vector<2x24xf32>
    %2 = vector.multi_reduction <add>, %1, %cst [2] : vector<2x24x256xf32> to vector<2x24xf32>
    %3 = arith.truncf %2 : vector<2x24xf32> to vector<2x24xbf16>
    %c0_2 = arith.constant 0 : index
    %c0_3 = arith.constant 0 : index
    %4 = vector.load %arg2[%c0_2, %c0_3] : memref<24x128xbf16, #tpu.memory_space<vmem>>, vector<24x128xbf16>
    %cst_4 = arith.constant dense<0.000000e+00> : vector<2x128xf32>
    %5 = tpu.matmul %3, %4, %cst_4 {dimension_numbers = #tpu.dot_dimension_numbers<[1], [0], [0], [1], [0, 0, 1, 1], [], []>} : vector<2x24xbf16>, vector<24x128xbf16>, vector<2x128xf32> -> vector<2x128xf32>
    %c0_5 = arith.constant 0 : index
    %c0_6 = arith.constant 0 : index
    %6 = vector.load %arg3[%c0_5, %c0_6] : memref<1x128xf32, #tpu.memory_space<vmem>>, vector<1x128xf32>
    %7 = vector.broadcast %6 : vector<1x128xf32> to vector<2x128xf32>
    %8 = arith.addf %5, %7 : vector<2x128xf32>
    %c0_7 = arith.constant 0 : index
    %c0_8 = arith.constant 0 : index
    %9 = vector.load %arg4[%c0_7, %c0_8] : memref<2x128xf32, #tpu.memory_space<vmem>>, vector<2x128xf32>
    tpu.vector_store %arg4[%c0_7, %c0_8], %8 {strides = array<i32>} : memref<2x128xf32, #tpu.memory_space<vmem>>, vector<2x128xf32>,
    return
  }
  func.func @transform_0(%arg0: i32) -> (i32, i32, i32) {
    %c0_i32 = arith.constant 0 : i32
    %c0_i32_0 = arith.constant 0 : i32
    %c0_i32_1 = arith.constant 0 : i32
    %c0_i32_2 = arith.constant 0 : i32
    return %c0_i32, %c0_i32_0, %c0_i32_1 : i32, i32, i32
  }
  func.func @transform_1(%arg0: i32) -> (i32, i32) {
    %c0_i32 = arith.constant 0 : i32
    %c0_i32_0 = arith.constant 0 : i32
    return %c0_i32, %arg0 : i32, i32
  }
  func.func @transform_2(%arg0: i32) -> (i32, i32) {
    %c0_i32 = arith.constant 0 : i32
    %c0_i32_0 = arith.constant 0 : i32
    return %c0_i32, %arg0 : i32, i32
  }
  func.func @transform_3(%arg0: i32) -> (i32, i32) {
    %c0_i32 = arith.constant 0 : i32
    %c0_i32_0 = arith.constant 0 : i32
    return %c0_i32, %arg0 : i32, i32
  }
}

</mosaic_0001>

<bundles_post_ra>
// kernel: tpu_custom_call.1
= control target key start
LH: loop header
LB: loop body
LE: loop exit
PB: predicated region body
PF: predicated region fallthrough
CT: control target
= control target key end

     0   :  { %8 = vsyncpa [#allocation3], 0  ;;  %s348_s0 = inlined_call_operand.hbm [shape: bf16[2,24,256], index: 0, kind: input, shape index: {}]   ;;  %s349_s1 = inlined_call_operand.hbm [shape: bf16[24,128], index: 1, kind: input, shape index: {}]   ;;  %s350_s2 = inlined_call_operand.vmem [shape: f32[1,128], index: 2, kind: input, shape index: {}]   ;;  %s351_s3 = inlined_call_operand.hbm [shape: f32[2,128], index: 3, kind: output, shape index: {}]  }
   0x1   :  { %9 = vsyncpa [#allocation6], 0 }
   0x2   :  { %10 = vsyncpa [#allocation4], 0  ;;  %s307_s12 = smov [#allocation2]  }
   0x3   :  { %s16_s13 = sshll.u32 %s307_s12, 4  ;;  %s17_s13 = int_to_ptr.vmem [resolvable:$true] %s16_s13 }
   0x4   :  { %s249_s14 = scalar_lea.vmem %s17_s13, 768  ;;  %p254_p1 = scmp.lt.s32.totalorder %s17_s13, %s17_s13 }
   0x5   :  { %p250_p0 = scmp.ne.s32.totalorder %s17_s13, %s249_s14  ;;  %p255_p2 = scmp.lt.s32.totalorder %s249_s14, %s249_s14 }
   0x7   :  { %p256_p3 = por %p255_p2, %p254_p1 }
   0x9   :  { %p257_p4 = pnand %p256_p3, %p250_p0 }
   0xb   :  { %260 = shalt.err (!%p257_p4)
}
   0xc   :  { %s308_s15 = smov 128   ;;  %s309_s16 = smov 8  }
   0xd   :  { %22 = dma.hbm_to_vmem [thread:$0]  %s348_s0, 768, %s17_s13, [#allocation3], %s308_s15, %s308_s15, %s309_s16  }
   0xe   :  { %s310_s19 = smov [#allocation5]  }
   0xf   :  { %s28_s20 = sshll.u32 %s310_s19, 4  ;;  %s29_s20 = int_to_ptr.vmem [resolvable:$true] %s28_s20 }
  0x10   :  { %s269_s21 = scalar_lea.vmem %s29_s20, 192  ;;  %p274_p6 = scmp.lt.s32.totalorder %s29_s20, %s29_s20 }
  0x11   :  { %p270_p5 = scmp.ne.s32.totalorder %s29_s20, %s269_s21  ;;  %p275_p7 = scmp.lt.s32.totalorder %s269_s21, %s269_s21 }
  0x13   :  { %p276_p8 = por %p275_p7, %p274_p6 }
  0x15   :  { %p277_p9 = pnand %p276_p8, %p270_p5 }
  0x17   :  { %280 = shalt.err (!%p277_p9)
}
  0x18   :  { %s311_s22 = smov 64   ;;  %s312_s23 = smov 4  }
  0x19   :  { %34 = dma.hbm_to_vmem [thread:$0]  %s349_s1, 192, %s29_s20, [#allocation6], %s311_s22, %s311_s22, %s312_s23  }
  0x1a   :  { %301 = dma.done.wait [#allocation3], 768  }
  0x1b   :  { %302 = vsyncadd [#allocation3], 4294966528 }
  0x1c   :  { %303 = dma.done.wait [#allocation6], 192  }
  0x1d   :  { %304 = vsyncadd [#allocation6], 4294967104  ;;  %v47_v0 = vld [vmem:[#allocation2 + $0x18] sm:$0xff]  ;;  %v44_v1 = vld [vmem:[#allocation2] sm:$0xff]  ;;  %vm154_vm0 = vcmask 1043456   ;;  %v313_v25 = vmov 0.0   ;;  %v104_v28 = vlaneseq }
  0x1e   :  { %v48_v2 = vld [vmem:[#allocation2 + $0x20] sm:$0xff]  ;;  %v56_v3 = vunpack.c.l.bf16 %v47_v0  ;;  %v57_v4 = vunpack.c.h.bf16 %v47_v0  ;;  %v50_v5 = vunpack.c.l.bf16 %v44_v1  ;;  %v51_v6 = vunpack.c.h.bf16 %v44_v1  ;;  %v45_v7 = vld [vmem:[#allocation2 + $0x8] sm:$0xff]  ;;  %v46_v9 = vld [vmem:[#allocation2 + $0x10] sm:$0xff]  ;;  %222 = vmatprep.subr.bf16.mxu0 %v313_v25  ;;  %s315_s26 = smov [#allocation7]  }
  0x1f   :  { %v49_v8 = vld [vmem:[#allocation2 + $0x28] sm:$0xff]  ;;  %v58_v10 = vunpack.c.l.bf16 %v48_v2  ;;  %v59_v11 = vunpack.c.h.bf16 %v48_v2  ;;  %v52_v12 = vunpack.c.l.bf16 %v45_v7  ;;  %v53_v13 = vunpack.c.h.bf16 %v45_v7  ;;  %v239_v24 = vld [vmem:[#allocation5 + $0x8] ss:$0 sps:$4 sm:$0xff]   ;;  %v240_v27 = vld [vmem:[#allocation5] sm:$0xff]   ;;  %s205_s27 = sshll.u32 %s315_s26, 4  ;;  %s206_s27 = int_to_ptr.vmem [resolvable:$true] %s205_s27 }
  0x20   :  { %v71_v14 = vadd.f32 %v57_v4, %v56_v3  ;;  %v62_v15 = vadd.f32 %v51_v6, %v50_v5  ;;  %v60_v16 = vunpack.c.l.bf16 %v49_v8  ;;  %v61_v17 = vunpack.c.h.bf16 %v49_v8  ;;  %v215_v0 = vld [vmem:[%s350_s2] ss:$0 sm:$0xff]  ;;  %s281_s28 = scalar_lea.vmem %s206_s27, 32  ;;  %p286_p11 = scmp.lt.s32.totalorder %s206_s27, %s206_s27 }
  0x21   :  { %v74_v18 = vadd.f32 %v59_v11, %v58_v10  ;;  %v65_v19 = vadd.f32 %v53_v13, %v52_v12  ;;  %v54_v20 = vunpack.c.l.bf16 %v46_v9  ;;  %v55_v21 = vunpack.c.h.bf16 %v46_v9  ;;  %p282_p10 = scmp.ne.s32.totalorder %s206_s27, %s281_s28  ;;  %p287_p12 = scmp.lt.s32.totalorder %s281_s28, %s281_s28 }
  0x22   :  { %72 = vadd.xlane.f32.xlu1 %v71_v14  ;;  %63 = vadd.xlane.f32.xlu0 %v62_v15  ;;  %v77_v22 = vadd.f32 %v61_v17, %v60_v16  ;;  %v156_v26 = vsel %vm154_vm0, %v239_v24, 0  ;;  %vm314_vm1 = vmmov 0   ;;  %v105_v29 = vand.u32 127, %v104_v28 }
  0x23   :  { %v68_v23 = vadd.f32 %v55_v21, %v54_v20  ;;  %223 = vmatpush3.bf16.msra.mxu0 %v156_v26  ;;  %226 = vmatprep.mubr.msk.bf16.mxu0 %vm314_vm1, %v313_v25  ;;  %v107_v32 = vshrl.u32 %v104_v28, 7  ;;  %vm115_vm2 = vcmask 130112   ;;  %vm122_vm3 = vcmask 195712   ;;  %p288_p13 = por %p287_p12, %p286_p11 }
  0x24   :  { %224 = vmatprep.subr.bf16.mxu0 %v313_v25  ;;  %v110_v33 = vadd.s32 4294967288, %v105_v29  ;;  %v117_v40 = vadd.s32 4294967280, %v105_v29  ;;  %vm138_vm4 = vcmask 1041409   ;;  %vm150_vm5 = vcmask 195584  }
  0x25   :  { %v108_v38 = vsub.s32 %v105_v29, %v107_v32  ;;  %p289_p0 = pnand %p288_p13, %p282_p10 }
  0x26   :  { %75 = vadd.xlane.f32.xlu1 %v74_v18  ;;  %66 = vadd.xlane.f32.xlu0 %v65_v19  ;;  %v113_v39 = vsub.s32 %v110_v33, %v107_v32  ;;  %v120_v47 = vsub.s32 %v117_v40, %v107_v32 }
  0x27   :  { %225 = vmatpush3.bf16.msra.mxu0 %v240_v27 }
  0x2a   :  { %78 = vadd.xlane.f32.xlu1 %v77_v22  ;;  %69 = vadd.xlane.f32.xlu0 %v68_v23 }
  0xab   :  { %v73_v30 = vpop.xlane.xlu1 %72  ;;  %v64_v31 = vpop.xlane.xlu0 %63 }
  0xaf   :  { %v76_v34 = vpop.xlane.xlu1 %75  ;;  %v67_v35 = vpop.xlane.xlu0 %66 }
  0xb0   :  { %v82_v36 = vpack.c.bf16 %v76_v34, %v73_v30  ;;  %v80_v37 = vpack.c.bf16 %v67_v35, %v64_v31 }
  0xb2   :  { %v101_v41 = vunpack.c.l.b16 %v82_v36  ;;  %v102_v42 = vunpack.c.h.b16 %v82_v36  ;;  %v98_v43 = vunpack.c.l.b16 %v80_v37  ;;  %v99_v44 = vunpack.c.h.b16 %v80_v37 }
  0xb3   :  { %v79_v45 = vpop.xlane.xlu1 %78  ;;  %v70_v46 = vpop.xlane.xlu0 %69 }
  0xb4   :  { %v83_v48 = vpack.c.bf16 %v79_v45, %v79_v45  ;;  %v81_v49 = vpack.c.bf16 %v70_v46, %v70_v46  ;;  %v127_v50 = vrot.slane %v101_v41, %v108_v38  ;;  %v131_v51 = vrot.slane %v102_v42, %v113_v39 }
  0xb5   :  { %v109_v52 = vrot.slane %v98_v43, %v108_v38  ;;  %v114_v53 = vrot.slane %v99_v44, %v113_v39 }
  0xb6   :  { %v103_v54 = vunpack.c.l.b16 %v83_v48  ;;  %v100_v55 = vunpack.c.l.b16 %v81_v49  ;;  %v132_v58 = vsel %vm115_vm2, %v131_v51, %v127_v50 }
  0xb7   :  { %v116_v59 = vsel %vm115_vm2, %v114_v53, %v109_v52 }
  0xb8   :  { %v136_v56 = vrot.slane %v103_v54, %v120_v47  ;;  %v121_v57 = vrot.slane %v100_v55, %v120_v47 }
  0xba   :  { %v137_v60 = vsel %vm122_vm3, %v136_v56, %v132_v58  ;;  %v123_v61 = vsel %vm122_vm3, %v121_v57, %v116_v59 }
  0xbb   :  { %v139_v62 = vsel %vm138_vm4, %v137_v60, %v123_v61 }
  0xbc   :  { %v140_v63 = vpack.c.b16 %v139_v62, %v139_v62 }
  0xbe   :  { %227 = vmatmul.mubr.msk.bf16.vlgmr.msra.gmra.mxu0 %vm150_vm5, %v140_v63 }
 0x17e   :  { %v192_v1 = vpop.f32.mrf.mxu0 }
 0x17f   :  { %v193_v2 = vadd.f32 %v215_v0, %v192_v1 }
 0x180   :  { %v228_v3 = vpop.f32.mrf.mxu0 }
 0x181   :  { %198 = vst [vmem:[#allocation7] sm:$0x3] %v193_v2 }
 0x182   :  { %v195_v4 = vpop.f32.mrf.mxu0 }
 0x183   :  { %292 = shalt.err (!%p289_p0)
}
 0x184   :  { %208 = dma.vmem_to_hbm [thread:$0]  %s206_s27, 32, %s351_s3, [#allocation4]   ;;  %v229_v5 = vpop.f32.mrf.mxu0 }
 0x185   :  { %305 = dma.done.wait [#allocation4], 32  }
 0x186   :  { %306 = vsyncadd [#allocation4], 4294967264 }
 0x187   :  { %212 = vsyncpa [#allocation3], 1 }
 0x188   :  { %213 = vsyncpa [#allocation6], 1 }
 0x189   :  { %214 = vsyncpa [#allocation4], 1 }

</bundles_post_ra>
